<compile_context>
chip_gen: v5e
topology: v5e:2x2
jax: 0.10.0
libtpu: 0.0.40
codegen_flags: <defaults>
</compile_context>

<pallas_src>
import math

import jax
import jax.numpy as jnp
from jax.experimental import pallas as pl
from jax.experimental.pallas import tpu as pltpu

# ----------------------------- model dims -----------------------------------
B = 2            # batch
M = 8            # modality_num
D = 128          # d_model
H = 4            # heads
DK = D // H      # d_k per head (32)
BM = B * M       # fused batch*modality rows (16)
EPS = 1e-5
SCALE = 1.0 / math.sqrt(DK)


# ----------------------------- Pallas kernel --------------------------------
def coattention_kernel(x_ref, w_ref, p_ref, o_ref):
    x = x_ref[...]                                   # (BM, D)   f32
    w = w_ref[...]                                   # (D, 4D)   bf16: [Wq|Wk|Wv|Wl]

    b_qkv = p_ref[0:1, :]                            # (1, 3D)   [bq|bk|bv]
    b_l = p_ref[1:2, 0:D]                            # (1, D)
    gamma = jnp.broadcast_to(p_ref[1:2, D:2 * D], (BM, D))      # hoisted once
    beta = jnp.broadcast_to(p_ref[1:2, 2 * D:3 * D], (BM, D))   # hoisted once

    # Fused QKV projection: one (BM,D) @ (D,3D) bf16 matmul, f32 accumulation.
    qkv = jnp.dot(x.astype(jnp.bfloat16), w[:, 0:3 * D],
                  preferred_element_type=jnp.float32) + b_qkv   # (BM, 3D) f32

    # 128-aligned lane slices (free), then split the sublane dim 16 -> (B, M).
    q3 = qkv[:, 0 * D:1 * D].reshape(B, M, D)
    k3 = qkv[:, 1 * D:2 * D].reshape(B, M, D)
    v3 = qkv[:, 2 * D:3 * D].reshape(B, M, D)

    # Multi-head SDPA: heads are static 32-lane column stripes (== the PyTorch
    # .view(B,-1,H,DK).transpose(1,2)); batch dim handled by a batched einsum.
    head_outs = []
    for h in range(H):
        lo = h * DK
        qh = q3[:, :, lo:lo + DK]                    # (B, M, DK)
        kh = k3[:, :, lo:lo + DK]
        vh = v3[:, :, lo:lo + DK]
        s = jnp.einsum("bqd,bkd->bqk", qh, kh,
                       preferred_element_type=jnp.float32) * SCALE       # (B, M, M)
        s = s - jnp.max(s, axis=-1, keepdims=True)
        p = jnp.exp(s)
        p = p * pl.reciprocal(jnp.sum(p, axis=-1, keepdims=True), approx=True)
        head_outs.append(jnp.einsum("bqk,bkd->bqd", p, vh,
                                    preferred_element_type=jnp.float32))  # (B, M, DK)
    attn = jnp.concatenate(head_outs, axis=-1).reshape(BM, D)             # (BM, D)

    def layer_norm(z):
        mu = jnp.mean(z, axis=-1, keepdims=True)
        var = jnp.mean((z - mu) * (z - mu), axis=-1, keepdims=True)
        return (z - mu) * jax.lax.rsqrt(var + EPS) * gamma + beta

    h1 = layer_norm(x + attn)                                             # AddNorm #1
    out_lin = jnp.dot(h1.astype(jnp.bfloat16), w[:, 3 * D:4 * D],
                      preferred_element_type=jnp.float32) + b_l           # output linear
    o_ref[...] = layer_norm(h1 + out_lin).astype(o_ref.dtype)             # AddNorm #2


# ----------------------------- wrapper ---------------------------------------
@jax.jit
def coattention_forward(x, w_all, params):
    # Single kernel invocation: no grid, full arrays resident in VMEM.
    # (On v7x a size-2 parallel grid could use the 2nd TensorCore, but at this
    #  problem size removing per-step overhead wins; everything fits in 64 MiB.)
    x2d = x.reshape(BM, D)
    out2d = pl.pallas_call(
        coattention_kernel,
        out_shape=jax.ShapeDtypeStruct((BM, D), jnp.float32),
        in_specs=[
            pl.BlockSpec(memory_space=pltpu.MemorySpace.VMEM),   # x
            pl.BlockSpec(memory_space=pltpu.MemorySpace.VMEM),   # packed weights (bf16)
            pl.BlockSpec(memory_space=pltpu.MemorySpace.VMEM),   # packed vectors (f32)
        ],
        out_specs=pl.BlockSpec(memory_space=pltpu.MemorySpace.VMEM),
    )(x2d, w_all, params)
    return out2d.reshape(B, M, D)


# ----------------------------- pure-JAX reference ----------------------------
def coattention_reference(x, w_all, params):
    # Mirrors the kernel numerics: bf16 weights / bf16 activations into the
    # projection matmuls, f32 accumulation, f32 softmax & LayerNorm.
    x2 = x.reshape(BM, D)
    qkv = jnp.dot(x2.astype(jnp.bfloat16), w_all[:, 0:3 * D],
                  preferred_element_type=jnp.float32) + params[0, :]
    q, k, v = qkv[:, 0:D], qkv[:, D:2 * D], qkv[:, 2 * D:3 * D]

    def split(t):                                    # (BM, D) -> (B, H, M, DK)
        return t.reshape(B, M, H, DK).transpose(0, 2, 1, 3)

    qh, kh, vh = split(q), split(k), split(v)
    s = jnp.einsum("bhmd,bhnd->bhmn", qh, kh,
                   preferred_element_type=jnp.float32) * SCALE
    p = jax.nn.softmax(s, axis=-1)
    ao = jnp.einsum("bhmn,bhnd->bhmd", p, vh, preferred_element_type=jnp.float32)
    ao = ao.transpose(0, 2, 1, 3).reshape(BM, D)

    b_l = params[1, 0:D]
    gamma = params[1, D:2 * D]
    beta = params[1, 2 * D:3 * D]

    def ln(z):
        mu = jnp.mean(z, axis=-1, keepdims=True)
        var = jnp.mean((z - mu) ** 2, axis=-1, keepdims=True)
        return (z - mu) / jnp.sqrt(var + EPS) * gamma + beta

    h1 = ln(x2 + ao)
    out_lin = jnp.dot(h1.astype(jnp.bfloat16), w_all[:, 3 * D:4 * D],
                      preferred_element_type=jnp.float32) + b_l
    return ln(h1 + out_lin).reshape(B, M, D)


# ----------------------------- main -------------------------------------------
if __name__ == "__main__":
    key = jax.random.PRNGKey(0)
    ks = jax.random.split(key, 10)

    x = jax.random.normal(ks[0], (B, M, D), dtype=jnp.float32)

    bound = 1.0 / math.sqrt(D)

    def init_linear(kw, kb):
        # deterministic, roughly PyTorch-like uniform(-1/sqrt(D), 1/sqrt(D)); stored (in, out)
        w = jax.random.uniform(kw, (D, D), jnp.float32, -bound, bound)
        b = jax.random.uniform(kb, (D,), jnp.float32, -bound, bound)
        return w, b

    wq, bq = init_linear(ks[1], ks[2])
    wk, bk = init_linear(ks[3], ks[4])
    wv, bv = init_linear(ks[5], ks[6])
    wl, bl = init_linear(ks[7], ks[8])
    gamma = jnp.ones((D,), jnp.float32)
    beta = jnp.zeros((D,), jnp.float32)

    # Pack weights:  [Wq | Wk | Wv | W_linear]  ->  bf16 (D, 4D)
    w_all = jnp.concatenate([wq, wk, wv, wl], axis=1).astype(jnp.bfloat16)
    # Pack vectors into one (8, 3D) f32 operand:
    #   row 0: [bq | bk | bv]        row 1: [b_linear | gamma | beta]
    params = jnp.zeros((8, 3 * D), jnp.float32)
    params = params.at[0, :].set(jnp.concatenate([bq, bk, bv]))
    params = params.at[1, :].set(jnp.concatenate([bl, gamma, beta]))

    out = coattention_forward(x, w_all, params)
    out = jax.block_until_ready(out)

    ref = coattention_reference(x, w_all, params)
    assert out.shape == (B, M, D)
    # bf16 weights + MXU precision-mode differences + EUP approx reciprocal in the
    # softmax -> compare at 5e-3 (a wrong kernel would be off by O(0.1..1)).
    err = float(jnp.max(jnp.abs(out - ref)))
    assert jnp.allclose(out, ref, atol=5e-3, rtol=5e-3), err

    print("KERNEL_OK")
</pallas_src>

<mosaic_0001>
module attributes {stable_mosaic.version = 11 : i64} {
  func.func @coattention_kernel(%arg0: memref<16x128xf32, #tpu.memory_space<vmem>>, %arg1: memref<128x512xbf16, #tpu.memory_space<vmem>>, %arg2: memref<8x384xf32, #tpu.memory_space<vmem>>, %arg3: memref<16x128xf32, #tpu.memory_space<vmem>>) attributes {dimension_semantics = [], scalar_prefetch = 0 : i64, scratch_operands = 0 : i64, tpu.core_type = #tpu.core_type<tc>} {
    %c0 = arith.constant 0 : index
    %c0_0 = arith.constant 0 : index
    %0 = vector.load %arg0[%c0, %c0_0] : memref<16x128xf32, #tpu.memory_space<vmem>>, vector<16x128xf32>
    %c0_1 = arith.constant 0 : index
    %c0_2 = arith.constant 0 : index
    %1 = vector.load %arg1[%c0_1, %c0_2] : memref<128x512xbf16, #tpu.memory_space<vmem>>, vector<128x512xbf16>
    %c0_3 = arith.constant 0 : index
    %c0_4 = arith.constant 0 : index
    %2 = vector.load %arg2[%c0_3, %c0_4] : memref<8x384xf32, #tpu.memory_space<vmem>>, vector<1x384xf32>
    %c1 = arith.constant 1 : index
    %c0_5 = arith.constant 0 : index
    %3 = vector.load %arg2[%c1, %c0_5] : memref<8x384xf32, #tpu.memory_space<vmem>>, vector<1x128xf32>
    %c1_6 = arith.constant 1 : index
    %c128 = arith.constant 128 : index
    %4 = vector.load %arg2[%c1_6, %c128] : memref<8x384xf32, #tpu.memory_space<vmem>>, vector<1x128xf32>
    %5 = vector.shape_cast %4 : vector<1x128xf32> to vector<1x128xf32>
    %6 = vector.broadcast %5 : vector<1x128xf32> to vector<16x128xf32>
    %c1_7 = arith.constant 1 : index
    %c256 = arith.constant 256 : index
    %7 = vector.load %arg2[%c1_7, %c256] : memref<8x384xf32, #tpu.memory_space<vmem>>, vector<1x128xf32>
    %8 = vector.shape_cast %7 : vector<1x128xf32> to vector<1x128xf32>
    %9 = vector.broadcast %8 : vector<1x128xf32> to vector<16x128xf32>
    %10 = arith.truncf %0 : vector<16x128xf32> to vector<16x128xbf16>
    %11 = vector.extract_strided_slice %1 {offsets = [0, 0], sizes = [128, 384], strides = [1, 1]} : vector<128x512xbf16> to vector<128x384xbf16>
    %cst = arith.constant dense<0.000000e+00> : vector<16x384xf32>
    %12 = tpu.matmul %10, %11, %cst {dimension_numbers = #tpu.dot_dimension_numbers<[1], [0], [0], [1], [0, 0, 1, 1], [], []>} : vector<16x128xbf16>, vector<128x384xbf16>, vector<16x384xf32> -> vector<16x384xf32>
    %13 = vector.broadcast %2 : vector<1x384xf32> to vector<16x384xf32>
    %14 = arith.addf %12, %13 : vector<16x384xf32>
    %15 = vector.extract_strided_slice %14 {offsets = [0, 0], sizes = [16, 128], strides = [1, 1]} : vector<16x384xf32> to vector<16x128xf32>
    %16 = vector.shape_cast %15 : vector<16x128xf32> to vector<2x8x128xf32>
    %17 = vector.extract_strided_slice %14 {offsets = [0, 128], sizes = [16, 128], strides = [1, 1]} : vector<16x384xf32> to vector<16x128xf32>
    %18 = vector.shape_cast %17 : vector<16x128xf32> to vector<2x8x128xf32>
    %19 = vector.extract_strided_slice %14 {offsets = [0, 256], sizes = [16, 128], strides = [1, 1]} : vector<16x384xf32> to vector<16x128xf32>
    %20 = vector.shape_cast %19 : vector<16x128xf32> to vector<2x8x128xf32>
    %21 = vector.extract_strided_slice %16 {offsets = [0, 0, 0], sizes = [2, 8, 32], strides = [1, 1, 1]} : vector<2x8x128xf32> to vector<2x8x32xf32>
    %22 = vector.extract_strided_slice %18 {offsets = [0, 0, 0], sizes = [2, 8, 32], strides = [1, 1, 1]} : vector<2x8x128xf32> to vector<2x8x32xf32>
    %23 = vector.extract_strided_slice %20 {offsets = [0, 0, 0], sizes = [2, 8, 32], strides = [1, 1, 1]} : vector<2x8x128xf32> to vector<2x8x32xf32>
    "tpu.trace_start"() <{level = 10 : i32, message = "bqd,bkd->bqk"}> : () -> ()
    %cst_8 = arith.constant dense<0.000000e+00> : vector<2x8x8xf32>
    %24 = tpu.matmul %21, %22, %cst_8 {dimension_numbers = #tpu.dot_dimension_numbers<[2], [2], [1], [1], [0, 0, 0, 1, 1, 1], [0], [0]>} : vector<2x8x32xf32>, vector<2x8x32xf32>, vector<2x8x8xf32> -> vector<2x8x8xf32>
    "tpu.trace_stop"() : () -> ()
    %cst_9 = arith.constant 0.176776692 : f32
    %25 = vector.broadcast %cst_9 : f32 to vector<2x8x8xf32>
    %26 = arith.mulf %24, %25 : vector<2x8x8xf32>
    %cst_10 = arith.constant dense<0xFF800000> : vector<2x8xf32>
    %27 = vector.multi_reduction <maximumf>, %26, %cst_10 [2] : vector<2x8x8xf32> to vector<2x8xf32>
    %28 = vector.shape_cast %27 : vector<2x8xf32> to vector<2x8x1xf32>
    %29 = vector.broadcast %28 : vector<2x8x1xf32> to vector<2x8x8xf32>
    %30 = arith.subf %26, %29 : vector<2x8x8xf32>
    %31 = math.exp %30 : vector<2x8x8xf32>
    %cst_11 = arith.constant dense<0.000000e+00> : vector<2x8xf32>
    %32 = vector.multi_reduction <add>, %31, %cst_11 [2] : vector<2x8x8xf32> to vector<2x8xf32>
    %33 = vector.shape_cast %32 : vector<2x8xf32> to vector<2x8x1xf32>
    %34 = tpu.reciprocal %33 {approx = true} : vector<2x8x1xf32> -> vector<2x8x1xf32>
    %35 = vector.broadcast %34 : vector<2x8x1xf32> to vector<2x8x8xf32>
    %36 = arith.mulf %31, %35 : vector<2x8x8xf32>
    "tpu.trace_start"() <{level = 10 : i32, message = "bqk,bkd->bqd"}> : () -> ()
    %cst_12 = arith.constant dense<0.000000e+00> : vector<2x8x32xf32>
    %37 = tpu.matmul %36, %23, %cst_12 {dimension_numbers = #tpu.dot_dimension_numbers<[2], [1], [1], [2], [0, 0, 0, 1, 1, 2], [0], [0]>} : vector<2x8x8xf32>, vector<2x8x32xf32>, vector<2x8x32xf32> -> vector<2x8x32xf32>
    "tpu.trace_stop"() : () -> ()
    %38 = vector.extract_strided_slice %16 {offsets = [0, 0, 32], sizes = [2, 8, 32], strides = [1, 1, 1]} : vector<2x8x128xf32> to vector<2x8x32xf32>
    %39 = vector.extract_strided_slice %18 {offsets = [0, 0, 32], sizes = [2, 8, 32], strides = [1, 1, 1]} : vector<2x8x128xf32> to vector<2x8x32xf32>
    %40 = vector.extract_strided_slice %20 {offsets = [0, 0, 32], sizes = [2, 8, 32], strides = [1, 1, 1]} : vector<2x8x128xf32> to vector<2x8x32xf32>
    "tpu.trace_start"() <{level = 10 : i32, message = "bqd,bkd->bqk"}> : () -> ()
    %cst_13 = arith.constant dense<0.000000e+00> : vector<2x8x8xf32>
    %41 = tpu.matmul %38, %39, %cst_13 {dimension_numbers = #tpu.dot_dimension_numbers<[2], [2], [1], [1], [0, 0, 0, 1, 1, 1], [0], [0]>} : vector<2x8x32xf32>, vector<2x8x32xf32>, vector<2x8x8xf32> -> vector<2x8x8xf32>
    "tpu.trace_stop"() : () -> ()
    %cst_14 = arith.constant 0.176776692 : f32
    %42 = vector.broadcast %cst_14 : f32 to vector<2x8x8xf32>
    %43 = arith.mulf %41, %42 : vector<2x8x8xf32>
    %cst_15 = arith.constant dense<0xFF800000> : vector<2x8xf32>
    %44 = vector.multi_reduction <maximumf>, %43, %cst_15 [2] : vector<2x8x8xf32> to vector<2x8xf32>
    %45 = vector.shape_cast %44 : vector<2x8xf32> to vector<2x8x1xf32>
    %46 = vector.broadcast %45 : vector<2x8x1xf32> to vector<2x8x8xf32>
    %47 = arith.subf %43, %46 : vector<2x8x8xf32>
    %48 = math.exp %47 : vector<2x8x8xf32>
    %cst_16 = arith.constant dense<0.000000e+00> : vector<2x8xf32>
    %49 = vector.multi_reduction <add>, %48, %cst_16 [2] : vector<2x8x8xf32> to vector<2x8xf32>
    %50 = vector.shape_cast %49 : vector<2x8xf32> to vector<2x8x1xf32>
    %51 = tpu.reciprocal %50 {approx = true} : vector<2x8x1xf32> -> vector<2x8x1xf32>
    %52 = vector.broadcast %51 : vector<2x8x1xf32> to vector<2x8x8xf32>
    %53 = arith.mulf %48, %52 : vector<2x8x8xf32>
    "tpu.trace_start"() <{level = 10 : i32, message = "bqk,bkd->bqd"}> : () -> ()
    %cst_17 = arith.constant dense<0.000000e+00> : vector<2x8x32xf32>
    %54 = tpu.matmul %53, %40, %cst_17 {dimension_numbers = #tpu.dot_dimension_numbers<[2], [1], [1], [2], [0, 0, 0, 1, 1, 2], [0], [0]>} : vector<2x8x8xf32>, vector<2x8x32xf32>, vector<2x8x32xf32> -> vector<2x8x32xf32>
    "tpu.trace_stop"() : () -> ()
    %55 = vector.extract_strided_slice %16 {offsets = [0, 0, 64], sizes = [2, 8, 32], strides = [1, 1, 1]} : vector<2x8x128xf32> to vector<2x8x32xf32>
    %56 = vector.extract_strided_slice %18 {offsets = [0, 0, 64], sizes = [2, 8, 32], strides = [1, 1, 1]} : vector<2x8x128xf32> to vector<2x8x32xf32>
    %57 = vector.extract_strided_slice %20 {offsets = [0, 0, 64], sizes = [2, 8, 32], strides = [1, 1, 1]} : vector<2x8x128xf32> to vector<2x8x32xf32>
    "tpu.trace_start"() <{level = 10 : i32, message = "bqd,bkd->bqk"}> : () -> ()
    %cst_18 = arith.constant dense<0.000000e+00> : vector<2x8x8xf32>
    %58 = tpu.matmul %55, %56, %cst_18 {dimension_numbers = #tpu.dot_dimension_numbers<[2], [2], [1], [1], [0, 0, 0, 1, 1, 1], [0], [0]>} : vector<2x8x32xf32>, vector<2x8x32xf32>, vector<2x8x8xf32> -> vector<2x8x8xf32>
    "tpu.trace_stop"() : () -> ()
    %cst_19 = arith.constant 0.176776692 : f32
    %59 = vector.broadcast %cst_19 : f32 to vector<2x8x8xf32>
    %60 = arith.mulf %58, %59 : vector<2x8x8xf32>
    %cst_20 = arith.constant dense<0xFF800000> : vector<2x8xf32>
    %61 = vector.multi_reduction <maximumf>, %60, %cst_20 [2] : vector<2x8x8xf32> to vector<2x8xf32>
    %62 = vector.shape_cast %61 : vector<2x8xf32> to vector<2x8x1xf32>
    %63 = vector.broadcast %62 : vector<2x8x1xf32> to vector<2x8x8xf32>
    %64 = arith.subf %60, %63 : vector<2x8x8xf32>
    %65 = math.exp %64 : vector<2x8x8xf32>
    %cst_21 = arith.constant dense<0.000000e+00> : vector<2x8xf32>
    %66 = vector.multi_reduction <add>, %65, %cst_21 [2] : vector<2x8x8xf32> to vector<2x8xf32>
    %67 = vector.shape_cast %66 : vector<2x8xf32> to vector<2x8x1xf32>
    %68 = tpu.reciprocal %67 {approx = true} : vector<2x8x1xf32> -> vector<2x8x1xf32>
    %69 = vector.broadcast %68 : vector<2x8x1xf32> to vector<2x8x8xf32>
    %70 = arith.mulf %65, %69 : vector<2x8x8xf32>
    "tpu.trace_start"() <{level = 10 : i32, message = "bqk,bkd->bqd"}> : () -> ()
    %cst_22 = arith.constant dense<0.000000e+00> : vector<2x8x32xf32>
    %71 = tpu.matmul %70, %57, %cst_22 {dimension_numbers = #tpu.dot_dimension_numbers<[2], [1], [1], [2], [0, 0, 0, 1, 1, 2], [0], [0]>} : vector<2x8x8xf32>, vector<2x8x32xf32>, vector<2x8x32xf32> -> vector<2x8x32xf32>
    "tpu.trace_stop"() : () -> ()
    %72 = vector.extract_strided_slice %16 {offsets = [0, 0, 96], sizes = [2, 8, 32], strides = [1, 1, 1]} : vector<2x8x128xf32> to vector<2x8x32xf32>
    %73 = vector.extract_strided_slice %18 {offsets = [0, 0, 96], sizes = [2, 8, 32], strides = [1, 1, 1]} : vector<2x8x128xf32> to vector<2x8x32xf32>
    %74 = vector.extract_strided_slice %20 {offsets = [0, 0, 96], sizes = [2, 8, 32], strides = [1, 1, 1]} : vector<2x8x128xf32> to vector<2x8x32xf32>
    "tpu.trace_start"() <{level = 10 : i32, message = "bqd,bkd->bqk"}> : () -> ()
    %cst_23 = arith.constant dense<0.000000e+00> : vector<2x8x8xf32>
    %75 = tpu.matmul %72, %73, %cst_23 {dimension_numbers = #tpu.dot_dimension_numbers<[2], [2], [1], [1], [0, 0, 0, 1, 1, 1], [0], [0]>} : vector<2x8x32xf32>, vector<2x8x32xf32>, vector<2x8x8xf32> -> vector<2x8x8xf32>
    "tpu.trace_stop"() : () -> ()
    %cst_24 = arith.constant 0.176776692 : f32
    %76 = vector.broadcast %cst_24 : f32 to vector<2x8x8xf32>
    %77 = arith.mulf %75, %76 : vector<2x8x8xf32>
    %cst_25 = arith.constant dense<0xFF800000> : vector<2x8xf32>
    %78 = vector.multi_reduction <maximumf>, %77, %cst_25 [2] : vector<2x8x8xf32> to vector<2x8xf32>
    %79 = vector.shape_cast %78 : vector<2x8xf32> to vector<2x8x1xf32>
    %80 = vector.broadcast %79 : vector<2x8x1xf32> to vector<2x8x8xf32>
    %81 = arith.subf %77, %80 : vector<2x8x8xf32>
    %82 = math.exp %81 : vector<2x8x8xf32>
    %cst_26 = arith.constant dense<0.000000e+00> : vector<2x8xf32>
    %83 = vector.multi_reduction <add>, %82, %cst_26 [2] : vector<2x8x8xf32> to vector<2x8xf32>
    %84 = vector.shape_cast %83 : vector<2x8xf32> to vector<2x8x1xf32>
    %85 = tpu.reciprocal %84 {approx = true} : vector<2x8x1xf32> -> vector<2x8x1xf32>
    %86 = vector.broadcast %85 : vector<2x8x1xf32> to vector<2x8x8xf32>
    %87 = arith.mulf %82, %86 : vector<2x8x8xf32>
    "tpu.trace_start"() <{level = 10 : i32, message = "bqk,bkd->bqd"}> : () -> ()
    %cst_27 = arith.constant dense<0.000000e+00> : vector<2x8x32xf32>
    %88 = tpu.matmul %87, %74, %cst_27 {dimension_numbers = #tpu.dot_dimension_numbers<[2], [1], [1], [2], [0, 0, 0, 1, 1, 2], [0], [0]>} : vector<2x8x8xf32>, vector<2x8x32xf32>, vector<2x8x32xf32> -> vector<2x8x32xf32>
    "tpu.trace_stop"() : () -> ()
    %89 = tpu.concatenate %37, %54, %71, %88 in 2 : vector<2x8x32xf32>, vector<2x8x32xf32>, vector<2x8x32xf32>, vector<2x8x32xf32> -> vector<2x8x128xf32>
    %90 = vector.shape_cast %89 : vector<2x8x128xf32> to vector<16x128xf32>
    %91 = arith.addf %0, %90 : vector<16x128xf32>
    %cst_28 = arith.constant dense<0.000000e+00> : vector<16xf32>
    %92 = vector.multi_reduction <add>, %91, %cst_28 [1] : vector<16x128xf32> to vector<16xf32>
    %93 = vector.shape_cast %92 : vector<16xf32> to vector<16x1xf32>
    %cst_29 = arith.constant 1.280000e+02 : f32
    %94 = vector.broadcast %cst_29 : f32 to vector<16x1xf32>
    %95 = arith.divf %93, %94 : vector<16x1xf32>
    %96 = vector.broadcast %95 : vector<16x1xf32> to vector<16x128xf32>
    %97 = arith.subf %91, %96 : vector<16x128xf32>
    %98 = vector.broadcast %95 : vector<16x1xf32> to vector<16x128xf32>
    %99 = arith.subf %91, %98 : vector<16x128xf32>
    %100 = arith.mulf %97, %99 : vector<16x128xf32>
    %cst_30 = arith.constant dense<0.000000e+00> : vector<16xf32>
    %101 = vector.multi_reduction <add>, %100, %cst_30 [1] : vector<16x128xf32> to vector<16xf32>
    %102 = vector.shape_cast %101 : vector<16xf32> to vector<16x1xf32>
    %cst_31 = arith.constant 1.280000e+02 : f32
    %103 = vector.broadcast %cst_31 : f32 to vector<16x1xf32>
    %104 = arith.divf %102, %103 : vector<16x1xf32>
    %105 = vector.broadcast %95 : vector<16x1xf32> to vector<16x128xf32>
    %106 = arith.subf %91, %105 : vector<16x128xf32>
    %cst_32 = arith.constant 9.99999974E-6 : f32
    %107 = vector.broadcast %cst_32 : f32 to vector<16x1xf32>
    %108 = arith.addf %104, %107 : vector<16x1xf32>
    %109 = math.rsqrt %108 : vector<16x1xf32>
    %110 = vector.broadcast %109 : vector<16x1xf32> to vector<16x128xf32>
    %111 = arith.mulf %106, %110 : vector<16x128xf32>
    %112 = arith.mulf %111, %6 : vector<16x128xf32>
    %113 = arith.addf %112, %9 : vector<16x128xf32>
    %114 = arith.truncf %113 : vector<16x128xf32> to vector<16x128xbf16>
    %115 = vector.extract_strided_slice %1 {offsets = [0, 384], sizes = [128, 128], strides = [1, 1]} : vector<128x512xbf16> to vector<128x128xbf16>
    %cst_33 = arith.constant dense<0.000000e+00> : vector<16x128xf32>
    %116 = tpu.matmul %114, %115, %cst_33 {dimension_numbers = #tpu.dot_dimension_numbers<[1], [0], [0], [1], [0, 0, 1, 1], [], []>} : vector<16x128xbf16>, vector<128x128xbf16>, vector<16x128xf32> -> vector<16x128xf32>
    %117 = vector.broadcast %3 : vector<1x128xf32> to vector<16x128xf32>
    %118 = arith.addf %116, %117 : vector<16x128xf32>
    %119 = arith.addf %113, %118 : vector<16x128xf32>
    %cst_34 = arith.constant dense<0.000000e+00> : vector<16xf32>
    %120 = vector.multi_reduction <add>, %119, %cst_34 [1] : vector<16x128xf32> to vector<16xf32>
    %121 = vector.shape_cast %120 : vector<16xf32> to vector<16x1xf32>
    %cst_35 = arith.constant 1.280000e+02 : f32
    %122 = vector.broadcast %cst_35 : f32 to vector<16x1xf32>
    %123 = arith.divf %121, %122 : vector<16x1xf32>
    %124 = vector.broadcast %123 : vector<16x1xf32> to vector<16x128xf32>
    %125 = arith.subf %119, %124 : vector<16x128xf32>
    %126 = vector.broadcast %123 : vector<16x1xf32> to vector<16x128xf32>
    %127 = arith.subf %119, %126 : vector<16x128xf32>
    %128 = arith.mulf %125, %127 : vector<16x128xf32>
    %cst_36 = arith.constant dense<0.000000e+00> : vector<16xf32>
    %129 = vector.multi_reduction <add>, %128, %cst_36 [1] : vector<16x128xf32> to vector<16xf32>
    %130 = vector.shape_cast %129 : vector<16xf32> to vector<16x1xf32>
    %cst_37 = arith.constant 1.280000e+02 : f32
    %131 = vector.broadcast %cst_37 : f32 to vector<16x1xf32>
    %132 = arith.divf %130, %131 : vector<16x1xf32>
    %133 = vector.broadcast %123 : vector<16x1xf32> to vector<16x128xf32>
    %134 = arith.subf %119, %133 : vector<16x128xf32>
    %cst_38 = arith.constant 9.99999974E-6 : f32
    %135 = vector.broadcast %cst_38 : f32 to vector<16x1xf32>
    %136 = arith.addf %132, %135 : vector<16x1xf32>
    %137 = math.rsqrt %136 : vector<16x1xf32>
    %138 = vector.broadcast %137 : vector<16x1xf32> to vector<16x128xf32>
    %139 = arith.mulf %134, %138 : vector<16x128xf32>
    %140 = arith.mulf %139, %6 : vector<16x128xf32>
    %141 = arith.addf %140, %9 : vector<16x128xf32>
    %c0_39 = arith.constant 0 : index
    %c0_40 = arith.constant 0 : index
    %142 = vector.load %arg3[%c0_39, %c0_40] : memref<16x128xf32, #tpu.memory_space<vmem>>, vector<16x128xf32>
    tpu.vector_store %arg3[%c0_39, %c0_40], %141 {strides = array<i32>} : memref<16x128xf32, #tpu.memory_space<vmem>>, vector<16x128xf32>,
    return
  }
}

</mosaic_0001>

<bundles_post_ra>
// kernel: coattention_forward.1
= control target key start
LH: loop header
LB: loop body
LE: loop exit
PB: predicated region body
PF: predicated region fallthrough
CT: control target
= control target key end

     0   :  { %8 = vsyncpa [#allocation3], 0  ;;  %s1544_s0 = inlined_call_operand.hbm [shape: f32[16,128], index: 0, kind: input, shape index: {}]   ;;  %s1545_s1 = inlined_call_operand.hbm [shape: bf16[128,512], index: 1, kind: input, shape index: {}]   ;;  %s1546_s2 = inlined_call_operand.hbm [shape: f32[8,384], index: 2, kind: input, shape index: {}]   ;;  %s1547_s3 = inlined_call_operand.hbm [shape: f32[16,128], index: 3, kind: output, shape index: {}]  }
   0x1   :  { %9 = vsyncpa [#allocation6], 0  ;;  %s28_s14 = sshll.u32 %s1545_s1, 4  ;;  %s29_s14 = int_to_ptr.hbm [resolvable:$true] %s28_s14 }
   0x2   :  { %10 = vsyncpa [#allocation4], 0  ;;  %s1343_s15 = smov [#allocation5]   ;;  %s15_s19 = sshll.u32 %s1544_s0, 4  ;;  %s16_s19 = int_to_ptr.hbm [resolvable:$true] %s15_s19 }
   0x3   :  { %s30_s16 = sshll.u32 %s1343_s15, 4  ;;  %s1344_s20 = smov 256   ;;  %s31_s16 = int_to_ptr.vmem [resolvable:$true] %s30_s16 }
   0x4   :  { %s1345_s21 = smov 16   ;;  %s1346_s22 = smov [#allocation2]  }
   0x5   :  { %36 = dma.hbm_to_vmem [thread:$0]  %s29_s14, 4096, %s31_s16, [#allocation6], %s1344_s20, %s1344_s20, %s1345_s21  }
   0x6   :  { %s17_s23 = sshll.u32 %s1346_s22, 4  ;;  %s1347_s24 = smov 128   ;;  %s18_s23 = int_to_ptr.vmem [resolvable:$true] %s17_s23 }
   0x7   :  { %s1348_s25 = smov 8   ;;  %s42_s27 = sshll.u32 %s1546_s2, 4  ;;  %s43_s27 = int_to_ptr.hbm [resolvable:$true] %s42_s27 }
   0x8   :  { %23 = dma.hbm_to_vmem [thread:$0]  %s16_s19, 256, %s18_s23, [#allocation3], %s1347_s24, %s1347_s24, %s1348_s25  }
   0x9   :  { %s1349_s28 = smov [#allocation7]  }
   0xa   :  { %s44_s0 = sshll.u32 %s1349_s28, 4  ;;  %s45_s0 = int_to_ptr.vmem [resolvable:$true] %s44_s0 }
   0xb   :  { %47 = dma.hbm_to_vmem [thread:$0]  %s43_s27, 384, %s45_s0, [#allocation6]  }
   0xc   :  { %1337 = dma.done.wait [#allocation3], 256  }
   0xd   :  { %1338 = vsyncadd [#allocation3], 4294967040 }
   0xe   :  { %1339 = dma.done.wait [#allocation6], 4480  }
   0xf   :  { %1340 = vsyncadd [#allocation6], 4294962816  ;;  %v1084_v0 = vld [vmem:[#allocation5 + $0xe0] sm:$0xf]  ;;  %v1180_v1 = vld [vmem:[#allocation5 + $0xec] sm:$0xf0] }
  0x10   :  { %v1178_v2 = vld [vmem:[#allocation5 + $0xe4] sm:$0xf]  ;;  %v1085_v3 = vor.u32 %v1180_v1, %v1084_v0  ;;  %v1086_v4 = vld [vmem:[#allocation5 + $0xf0] sm:$0xf0]  ;;  %v1072_v5 = vld [vmem:[#allocation5 + $0xc0] sm:$0xf] }
  0x11   :  { %v1176_v6 = vld [vmem:[#allocation5 + $0xcc] sm:$0xf0]  ;;  %v1089_v7 = vor.u32 %v1178_v2, %v1086_v4  ;;  %v1174_v8 = vld [vmem:[#allocation5 + $0xc4] sm:$0xf]  ;;  %v1074_v9 = vld [vmem:[#allocation5 + $0xd0] sm:$0xf0] }
  0x12   :  { %234 = vmatpush.bf16.msra.mxu0 %v1085_v3  ;;  %v1073_v10 = vor.u32 %v1176_v6, %v1072_v5  ;;  %v1077_v11 = vor.u32 %v1174_v8, %v1074_v9  ;;  %v1060_v12 = vld [vmem:[#allocation5 + $0xa0] sm:$0xf]  ;;  %v1172_v13 = vld [vmem:[#allocation5 + $0xac] sm:$0xf0]  ;;  %v1170_v14 = vld [vmem:[#allocation5 + $0xa4] sm:$0xf] }
  0x13   :  { %248 = vmatpush.bf16.msra.mxu1 %v1089_v7  ;;  %v1062_v15 = vld [vmem:[#allocation5 + $0xb0] sm:$0xf0]  ;;  %v1061_v16 = vor.u32 %v1172_v13, %v1060_v12  ;;  %v1048_v18 = vld [vmem:[#allocation5 + $0x80] sm:$0xf]  ;;  %v1168_v19 = vld [vmem:[#allocation5 + $0x8c] sm:$0xf0] }
  0x14   :  { %v1065_v17 = vor.u32 %v1170_v14, %v1062_v15  ;;  %v1166_v20 = vld [vmem:[#allocation5 + $0x84] sm:$0xf]  ;;  %v1050_v21 = vld [vmem:[#allocation5 + $0x90] sm:$0xf0]  ;;  %v1049_v22 = vor.u32 %v1168_v19, %v1048_v18  ;;  %v1036_v24 = vld [vmem:[#allocation5 + $0x60] sm:$0xf] }
  0x15   :  { %v1053_v23 = vor.u32 %v1166_v20, %v1050_v21  ;;  %v1164_v25 = vld [vmem:[#allocation5 + $0x6c] sm:$0xf0]  ;;  %v1162_v26 = vld [vmem:[#allocation5 + $0x64] sm:$0xf]  ;;  %v1038_v27 = vld [vmem:[#allocation5 + $0x70] sm:$0xf0] }
  0x16   :  { %235 = vmatpush.bf16.msra.mxu0 %v1073_v10  ;;  %v1037_v28 = vor.u32 %v1164_v25, %v1036_v24  ;;  %v1041_v29 = vor.u32 %v1162_v26, %v1038_v27  ;;  %v1024_v30 = vld [vmem:[#allocation5 + $0x40] sm:$0xf]  ;;  %v1160_v31 = vld [vmem:[#allocation5 + $0x4c] sm:$0xf0]  ;;  %v1158_v32 = vld [vmem:[#allocation5 + $0x44] sm:$0xf] }
  0x17   :  { %249 = vmatpush.bf16.msra.mxu1 %v1077_v11  ;;  %v1026_v33 = vld [vmem:[#allocation5 + $0x50] sm:$0xf0]  ;;  %v1025_v34 = vor.u32 %v1160_v31, %v1024_v30  ;;  %v1012_v36 = vld [vmem:[#allocation5 + $0x20] sm:$0xf]  ;;  %v1156_v37 = vld [vmem:[#allocation5 + $0x2c] sm:$0xf0] }
  0x18   :  { %v1029_v35 = vor.u32 %v1158_v32, %v1026_v33  ;;  %v1154_v38 = vld [vmem:[#allocation5 + $0x24] sm:$0xf]  ;;  %v1014_v39 = vld [vmem:[#allocation5 + $0x30] sm:$0xf0]  ;;  %v1013_v40 = vor.u32 %v1156_v37, %v1012_v36  ;;  %v1000_v42 = vld [vmem:[#allocation5] sm:$0xf] }
  0x19   :  { %v1017_v41 = vor.u32 %v1154_v38, %v1014_v39  ;;  %v1152_v43 = vld [vmem:[#allocation5 + $0xc] sm:$0xf0]  ;;  %v1150_v44 = vld [vmem:[#allocation5 + $0x4] sm:$0xf]  ;;  %v1002_v45 = vld [vmem:[#allocation5 + $0x10] sm:$0xf0] }
  0x1a   :  { %236 = vmatpush.bf16.msra.mxu0 %v1061_v16  ;;  %v1001_v46 = vor.u32 %v1152_v43, %v1000_v42  ;;  %v1387_v47 = vld [vmem:[#allocation2] sm:$0xff]  ;;  %v1389_v48 = vld [vmem:[#allocation2 + $0x8] sm:$0xff]  ;;  %v1005_v49 = vor.u32 %v1150_v44, %v1002_v45  ;;  %vm276_vm0 = vcmask 261120   ;;  %s1350_s2 = smov 96   ;;  %s1351_s29 = smov 64   ;;  %vm331_vm1 = vcmask 64512  }
  0x1b   :  { %250 = vmatpush.bf16.msra.mxu1 %v1065_v17  ;;  %v1393_v50 = vpack.c.bf16 %v1389_v48, %v1387_v47  ;;  %v1397_v51 = vld [vmem:[#allocation7] ss:$8 sm:$0x7]  ;;  %v1181_v0 = vld [vmem:[#allocation5 + $0xf4] sm:$0xf0]  ;;  %s1352_s30 = smov 32  }
  0x1c   :  { %v101_v52 = vperm.slane %v1397_v51, 1  ;;  %v100_v53 = vperm.slane %v1397_v51, 0  ;;  %v1092_v63 = vld [vmem:[#allocation5 + $0xe8] sm:$0xf]  ;;  %v1177_v4 = vld [vmem:[#allocation5 + $0xd4] sm:$0xf0] }
  0x1d   :  { %v1080_v1 = vld [vmem:[#allocation5 + $0xc8] sm:$0xf]  ;;  %v1093_v3 = vor.u32 %v1181_v0, %v1092_v63  ;;  %v1173_v8 = vld [vmem:[#allocation5 + $0xb4] sm:$0xf0]  ;;  %v102_v38 = vperm.slane %v1397_v51, 2  ;;  %vm824_vm2 = vcmask 523264  }
  0x1e   :  { %237 = vmatpush.bf16.msra.mxu0 %v1049_v22  ;;  %v1081_v6 = vor.u32 %v1177_v4, %v1080_v1  ;;  %v1068_v7 = vld [vmem:[#allocation5 + $0xa8] sm:$0xf]  ;;  %v1169_v12 = vld [vmem:[#allocation5 + $0x94] sm:$0xf0]  ;;  %vm827_vm3 = vcmask 785408   ;;  %s1354_s4 = smov [#allocation8]  }
  0x1f   :  { %251 = vmatpush.bf16.msra.mxu1 %v1053_v23  ;;  %262 = vmatpush.bf16.msra.mxu2 %v1093_v3  ;;  %v1069_v9 = vor.u32 %v1173_v8, %v1068_v7  ;;  %v1056_v11 = vld [vmem:[#allocation5 + $0x88] sm:$0xf]  ;;  %v1165_v17 = vld [vmem:[#allocation5 + $0x74] sm:$0xf0]  ;;  %s982_s5 = sshll.u32 %s1354_s4, 4  ;;  %s984_s8 = sshll.u32 %s1547_s3, 4  ;;  %s983_s5 = int_to_ptr.vmem [resolvable:$true] %s982_s5  ;;  %s985_s8 = int_to_ptr.hbm [resolvable:$true] %s984_s8 }
  0x20   :  { %v1057_v15 = vor.u32 %v1169_v12, %v1056_v11  ;;  %v1044_v16 = vld [vmem:[#allocation5 + $0x68] sm:$0xf]  ;;  %v1161_v20 = vld [vmem:[#allocation5 + $0x54] sm:$0xf0] }
  0x21   :  { %v1045_v18 = vor.u32 %v1165_v17, %v1044_v16  ;;  %v1032_v19 = vld [vmem:[#allocation5 + $0x48] sm:$0xf]  ;;  %v1157_v23 = vld [vmem:[#allocation5 + $0x34] sm:$0xf0] }
  0x22   :  { %238 = vmatpush.bf16.msra.mxu0 %v1037_v28  ;;  %v1033_v21 = vor.u32 %v1161_v20, %v1032_v19  ;;  %v1020_v22 = vld [vmem:[#allocation5 + $0x28] sm:$0xf]  ;;  %v1153_v26 = vld [vmem:[#allocation5 + $0x14] sm:$0xf0] }
  0x23   :  { %252 = vmatpush.bf16.msra.mxu1 %v1041_v29  ;;  %263 = vmatpush.bf16.msra.mxu2 %v1081_v6  ;;  %v1021_v24 = vor.u32 %v1157_v23, %v1020_v22  ;;  %v1008_v25 = vld [vmem:[#allocation5 + $0x8] sm:$0xf] }
  0x24   :  { %v1009_v27 = vor.u32 %v1153_v26, %v1008_v25 }
  0x26   :  { %239 = vmatpush.bf16.msra.mxu0 %v1025_v34 }
  0x27   :  { %253 = vmatpush.bf16.msra.mxu1 %v1029_v35  ;;  %264 = vmatpush.bf16.msra.mxu2 %v1069_v9 }
  0x2a   :  { %240 = vmatpush.bf16.msra.mxu0 %v1013_v40 }
  0x2b   :  { %254 = vmatpush.bf16.msra.mxu1 %v1017_v41  ;;  %265 = vmatpush.bf16.msra.mxu2 %v1057_v15 }
  0x2e   :  { %241 = vmatpush.bf16.msra.mxu0 %v1001_v46 }
  0x2f   :  { %255 = vmatpush.bf16.msra.mxu1 %v1005_v49  ;;  %266 = vmatpush.bf16.msra.mxu2 %v1045_v18 }
  0x31   :  { %242 = vmatmul.bf16.vlgmr.msra.gmra.mxu0 %v1393_v50 }
  0x32   :  { %256 = vmatmul.bf16.vlgmr.msra.gmra.mxu1 %v1393_v50 }
  0x33   :  { %267 = vmatpush.bf16.msra.mxu2 %v1033_v21 }
  0x37   :  { %268 = vmatpush.bf16.msra.mxu2 %v1021_v24 }
  0x3b   :  { %269 = vmatpush.bf16.msra.mxu2 %v1009_v27 }
  0x3e   :  { %270 = vmatmul.bf16.vlgmr.msra.gmra.mxu2 %v1393_v50 }
  0xae   :  { %v243_v54 = vpop.f32.mrf.mxu0 }
  0xaf   :  { %v257_v55 = vpop.f32.mrf.mxu1  ;;  %v1403_v57 = vadd.f32 %v243_v54, %v100_v53 }
  0xb0   :  { %v1401_v56 = vadd.f32 %v257_v55, %v101_v52 }
  0xb2   :  { %402 = vrot.lane.b32.xlu2 %v1401_v56, %s1350_s2  ;;  %1094 = vmatpush.xpose.msk.msra.mxu3 %vm276_vm0, %v1401_v56 }
  0xb5   :  { %1095 = vmatmul.msk.f32.vlgmr.msra.gmra.mxu3 %vm276_vm0, %v1403_v57 }
  0xb6   :  { %v245_v59 = vpop.f32.mrf.mxu0 }
  0xb7   :  { %v259_v58 = vpop.f32.mrf.mxu1  ;;  %v1417_v61 = vadd.f32 %v245_v59, %v100_v53 }
  0xb8   :  { %v1411_v60 = vadd.f32 %v259_v58, %v101_v52 }
  0xba   :  { %1096 = vmatpush.xpose.msk.msrb.mxu3 %vm276_vm0, %v1411_v60  ;;  %400 = vrot.lane.b32.xlu2 %v1403_v57, %s1350_s2 }
  0xbd   :  { %1097 = vmatmul.msk.f32.vlgmr.msrb.gmra.mxu3 %vm276_vm0, %v1417_v61 }
  0xc1   :  { %v271_v39 = vpop.f32.mrf.mxu2 }
  0xc2   :  { %536 = vrot.lane.b32.xlu2 %v1401_v56, %s1351_s29  ;;  %v1435_v40 = vadd.f32 %v271_v39, %v102_v38 }
  0xc4   :  { %372 = vmatpush.msra.mxu3 %v1435_v40 }
  0xc9   :  { %v273_v41 = vpop.f32.mrf.mxu2 }
  0xca   :  { %534 = vrot.lane.b32.xlu2 %v1403_v57, %s1351_s29  ;;  %v1440_v42 = vadd.f32 %v273_v41, %v102_v38 }
  0xcc   :  { %395 = vmatpush.msrb.mxu3 %v1440_v42 }
 0x10c   :  { %v403_v44 = vpop.permute.xlu2 %402 }
 0x114   :  { %v401_v51 = vpop.permute.xlu2 %400 }
 0x11c   :  { %v537_v54 = vpop.permute.xlu2 %536 }
 0x124   :  { %v535_v58 = vpop.permute.xlu2 %534 }
 0x138   :  { %v300_v62 = vpop.f32.mrf.mxu3 }
 0x139   :  { %v329_v2 = vmul.f32 0.17677669, %v300_v62 }
 0x13b   :  { %v332_v5 = vsel %vm331_vm1, %v329_v2, -inf }
 0x13c   :  { %333 = vmax.xlane.f32.xlu0 %v332_v5 }
 0x140   :  { %v326_v10 = vpop.f32.mrf.mxu3 }
 0x141   :  { %v330_v13 = vmul.f32 0.17677669, %v326_v10 }
 0x143   :  { %v335_v14 = vsel %vm331_vm1, %v330_v13, -inf }
 0x144   :  { %336 = vmax.xlane.f32.xlu0 %v335_v14 }
 0x158   :  { %430 = vrot.lane.b32.xlu0 %v1411_v60, %s1350_s2 }
 0x1af   :  { %v334_v28 = vpop.xlane.xlu0 %333 }
 0x1b0   :  { %v338_v29 = vsub.f32 %v329_v2, %v334_v28 }
 0x1b2   :  { %v340_v30 = vmul.f32 1.442695, %v338_v29 }
 0x1b4   :  { %1199 = vpow2.f32 %v340_v30 }
 0x1b7   :  { %v337_v31 = vpop.xlane.xlu0 %336 }
 0x1b8   :  { %v339_v32 = vsub.f32 %v330_v13, %v337_v31 }
 0x1ba   :  { %v1200_v33 = vpop.eup %1199  ;;  %v342_v34 = vmul.f32 1.442695, %v339_v32 }
 0x1bb   :  { %v344_v35 = vsel %vm331_vm1, %v1200_v33, 0.0 }
 0x1bc   :  { %1201 = vpow2.f32 %v342_v34  ;;  %345 = vadd.xlane.f32.xlu1 %v344_v35 }
 0x1c2   :  { %v1202_v36 = vpop.eup %1201 }
 0x1c3   :  { %v347_v37 = vsel %vm331_vm1, %v1202_v36, 0.0 }
 0x1c4   :  { %348 = vadd.xlane.f32.xlu1 %v347_v37 }
 0x1ca   :  { %v431_v53 = vpop.permute.xlu0 %430 }
 0x1dd   :  { %428 = vrot.lane.b32.xlu1 %v1417_v61, %s1350_s2 }
 0x1e5   :  { %562 = vrot.lane.b32.xlu1 %v1417_v61, %s1351_s29 }
 0x22f   :  { %v346_v43 = vpop.xlane.xlu1 %345 }
 0x230   :  { %1203 = vrcp.f32 %v346_v43 }
 0x236   :  { %v1204_v45 = vpop.eup %1203 }
 0x237   :  { %v352_v46 = vmul.f32 %v1204_v45, %v1200_v33  ;;  %v349_v49 = vpop.xlane.xlu1 %348 }
 0x238   :  { %1205 = vrcp.f32 %v349_v49 }
 0x239   :  { %1098 = vmatmul.msk.f32.vlgmr.msra.gmra.mxu3 %vm331_vm1, %v352_v46 }
 0x23a   :  { %1100 = vmatpush.xpose.msk.msra.mxu3 %vm276_vm0, %v403_v44 }
 0x23e   :  { %v1206_v50 = vpop.eup %1205 }
 0x23f   :  { %v353_v52 = vmul.f32 %v1206_v50, %v1202_v36 }
 0x241   :  { %1099 = vmatmul.msk.f32.vlgmr.msrb.gmra.mxu3 %vm331_vm1, %v353_v52 }
 0x242   :  { %1102 = vmatpush.xpose.msk.msrb.mxu3 %vm276_vm0, %v431_v53 }
 0x249   :  { %1101 = vmatmul.msk.f32.vlgmr.msra.gmra.mxu3 %vm276_vm0, %v401_v51 }
 0x24a   :  { %1106 = vmatpush.xpose.msk.msra.mxu3 %vm276_vm0, %v537_v54 }
 0x24f   :  { %v429_v55 = vpop.permute.xlu1 %428 }
 0x251   :  { %1103 = vmatmul.msk.f32.vlgmr.msrb.gmra.mxu3 %vm276_vm0, %v429_v55 }
 0x257   :  { %v563_v12 = vpop.permute.xlu1 %562 }
 0x259   :  { %1107 = vmatmul.msk.f32.vlgmr.msra.gmra.mxu3 %vm276_vm0, %v535_v58 }
 0x2bc   :  { %v1451_v59 = vpop.f32.mrf.mxu3 }
 0x2c4   :  { %v1453_v62 = vpop.f32.mrf.mxu3 }
 0x2cc   :  { %v425_v63 = vpop.f32.mrf.mxu3 }
 0x2cd   :  { %v456_v0 = vmul.f32 0.17677669, %v425_v63 }
 0x2cf   :  { %v458_v1 = vsel %vm331_vm1, %v456_v0, -inf }
 0x2d0   :  { %459 = vmax.xlane.f32.xlu2 %v458_v1 }
 0x2d4   :  { %v453_v2 = vpop.f32.mrf.mxu3 }
 0x2d5   :  { %v457_v6 = vmul.f32 0.17677669, %v453_v2 }
 0x2d7   :  { %v461_v7 = vsel %vm331_vm1, %v457_v6, -inf }
 0x2dc   :  { %v559_v3 = vpop.f32.mrf.mxu3 }
 0x2dd   :  { %v590_v4 = vmul.f32 0.17677669, %v559_v3 }
 0x2df   :  { %v592_v5 = vsel %vm331_vm1, %v590_v4, -inf }
 0x2e0   :  { %593 = vmax.xlane.f32.xlu0 %v592_v5 }
 0x2e8   :  { %564 = vrot.lane.b32.xlu2 %v1411_v60, %s1351_s29 }
 0x2f0   :  { %696 = vrot.lane.b32.xlu2 %v1411_v60, %s1352_s30 }
 0x2f4   :  { %481 = vrot.lane.b32.xlu0 %v1435_v40, %s1350_s2 }
 0x2fc   :  { %614 = vrot.lane.b32.xlu0 %v1435_v40, %s1351_s29 }
 0x304   :  { %694 = vrot.lane.b32.xlu0 %v1417_v61, %s1352_s30 }
 0x32e   :  { %462 = vmax.xlane.f32.xlu0 %v461_v7 }
 0x343   :  { %v460_v8 = vpop.xlane.xlu2 %459 }
 0x344   :  { %v464_v9 = vsub.f32 %v456_v0, %v460_v8 }
 0x346   :  { %v466_v10 = vmul.f32 1.442695, %v464_v9 }
 0x348   :  { %1207 = vpow2.f32 %v466_v10 }
 0x34b   :  { %v565_v11 = vpop.permute.xlu2 %564 }
 0x34c   :  { %1108 = vmatpush.xpose.msk.msrb.mxu3 %vm276_vm0, %v565_v11 }
 0x34e   :  { %v1208_v60 = vpop.eup %1207 }
 0x34f   :  { %1109 = vmatmul.msk.f32.vlgmr.msrb.gmra.mxu3 %vm276_vm0, %v563_v12  ;;  %v470_v13 = vsel %vm331_vm1, %v1208_v60, 0.0 }
 0x350   :  { %471 = vadd.xlane.f32.xlu1 %v470_v13 }
 0x353   :  { %v697_v14 = vpop.permute.xlu2 %696  ;;  %v594_v61 = vpop.xlane.xlu0 %593 }
 0x354   :  { %v598_v15 = vsub.f32 %v590_v4, %v594_v61  ;;  %1114 = vmatpush.xpose.msk.msra.mxu3 %vm276_vm0, %v697_v14  ;;  %v1194_v4 = vpack.i.bf16 %v1440_v42, %v1435_v40 }
 0x356   :  { %v600_v16 = vmul.f32 1.442695, %v598_v15 }
 0x358   :  { %1209 = vpow2.f32 %v600_v16 }
 0x35e   :  { %v1210_v17 = vpop.eup %1209 }
 0x35f   :  { %v604_v18 = vsel %vm331_vm1, %v1210_v17, 0.0 }
 0x360   :  { %605 = vadd.xlane.f32.xlu2 %v604_v18 }
 0x366   :  { %v482_v19 = vpop.permute.xlu0 %481 }
 0x367   :  { %502 = vmatpush.msrb.mxu0 %v482_v19 }
 0x369   :  { %668 = vrot.lane.b32.xlu1 %v1401_v56, %s1352_s30 }
 0x36e   :  { %v615_v20 = vpop.permute.xlu0 %614 }
 0x36f   :  { %635 = vmatpush.msra.mxu0 %v615_v20 }
 0x376   :  { %v695_v21 = vpop.permute.xlu0 %694 }
 0x377   :  { %1115 = vmatmul.msk.f32.vlgmr.msra.gmra.mxu3 %vm276_vm0, %v695_v21 }
 0x378   :  { %666 = vrot.lane.b32.xlu2 %v1403_v57, %s1352_s30 }
 0x3a1   :  { %v463_v23 = vpop.xlane.xlu0 %462 }
 0x3a2   :  { %v465_v25 = vsub.f32 %v457_v6, %v463_v23 }
 0x3a4   :  { %v468_v27 = vmul.f32 1.442695, %v465_v25 }
 0x3c3   :  { %v472_v22 = vpop.xlane.xlu1 %471 }
 0x3c4   :  { %1211 = vrcp.f32 %v472_v22 }
 0x3c5   :  { %1213 = vpow2.f32 %v468_v27 }
 0x3ca   :  { %v1212_v24 = vpop.eup %1211 }
 0x3cb   :  { %v478_v26 = vmul.f32 %v1212_v24, %v1208_v60  ;;  %v1214_v31 = vpop.eup %1213 }
 0x3cc   :  { %v473_v34 = vsel %vm331_vm1, %v1214_v31, 0.0 }
 0x3cd   :  { %1104 = vmatmul.msk.f32.vlgmr.msrb.gmra.mxu0 %vm331_vm1, %v478_v26 }
 0x3d2   :  { %v587_v28 = vpop.f32.mrf.mxu3 }
 0x3d3   :  { %v591_v56 = vmul.f32 0.17677669, %v587_v28  ;;  %v606_v29 = vpop.xlane.xlu2 %605 }
 0x3d4   :  { %1215 = vrcp.f32 %v606_v29 }
 0x3d5   :  { %v595_v30 = vsel %vm331_vm1, %v591_v56, -inf }
 0x3d6   :  { %596 = vmax.xlane.f32.xlu1 %v595_v30 }
 0x3da   :  { %v1216_v32 = vpop.eup %1215 }
 0x3db   :  { %v612_v57 = vmul.f32 %v1216_v32, %v1210_v17  ;;  %v669_v33 = vpop.permute.xlu1 %668  ;;  %v667_v35 = vpop.permute.xlu2 %666 }
 0x3dc   :  { %1112 = vmatpush.xpose.msk.msrb.mxu0 %vm276_vm0, %v669_v33 }
 0x3dd   :  { %1110 = vmatmul.msk.f32.vlgmr.msra.gmra.mxu0 %vm331_vm1, %v612_v57 }
 0x3de   :  { %474 = vadd.xlane.f32.xlu1 %v473_v34 }
 0x3e5   :  { %1113 = vmatmul.msk.f32.vlgmr.msrb.gmra.mxu0 %vm276_vm0, %v667_v35  ;;  %v1353_v35 = vmov 128.0  }
 0x3fa   :  { %v719_v36 = vpop.f32.mrf.mxu3 }
 0x3fb   :  { %v723_v37 = vmul.f32 0.17677669, %v719_v36 }
 0x3fd   :  { %v727_v38 = vsel %vm331_vm1, %v723_v37, -inf }
 0x3fe   :  { %728 = vmax.xlane.f32.xlu0 %v727_v38 }
 0x412   :  { %508 = vrot.lane.b32.xlu0 %v1440_v42, %s1350_s2 }
 0x449   :  { %v597_v41 = vpop.xlane.xlu1 %596 }
 0x44a   :  { %v504_v39 = vpop.f32.mrf.mxu0  ;;  %v599_v44 = vsub.f32 %v591_v56, %v597_v41 }
 0x44b   :  { %800 = vrot.lane.b32.xlu0 %v504_v39, %s1352_s30 }
 0x44c   :  { %v602_v45 = vmul.f32 1.442695, %v599_v44 }
 0x44e   :  { %1217 = vpow2.f32 %v602_v45 }
 0x451   :  { %v475_v58 = vpop.xlane.xlu1 %474 }
 0x454   :  { %v1218_v51 = vpop.eup %1217 }
 0x455   :  { %v607_v52 = vsel %vm331_vm1, %v1218_v51, 0.0 }
 0x45a   :  { %v637_v43 = vpop.f32.mrf.mxu0 }
 0x462   :  { %v691_v46 = vpop.f32.mrf.mxu0 }
 0x463   :  { %v722_v49 = vmul.f32 0.17677669, %v691_v46 }
 0x465   :  { %v724_v50 = vsel %vm331_vm1, %v722_v49, -inf }
 0x466   :  { %725 = vmax.xlane.f32.xlu2 %v724_v50  ;;  %v1179_v50 = vld [vmem:[#allocation5 + $0xec] sm:$0xf] }
 0x46e   :  { %608 = vadd.xlane.f32.xlu2 %v607_v52 }
 0x471   :  { %v729_v53 = vpop.xlane.xlu0 %728 }
 0x472   :  { %v731_v54 = vsub.f32 %v723_v37, %v729_v53  ;;  %v1175_v53 = vld [vmem:[#allocation5 + $0xcc] sm:$0xf] }
 0x474   :  { %v734_v55 = vmul.f32 1.442695, %v731_v54  ;;  %v1142_v54 = vld [vmem:[#allocation5 + $0xd8] sm:$0xf0] }
 0x476   :  { %1219 = vpow2.f32 %v734_v55  ;;  %v1145_v55 = vor.u32 %v1175_v53, %v1142_v54 }
 0x477   :  { %1221 = vrcp.f32 %v475_v58  ;;  %v1171_v58 = vld [vmem:[#allocation5 + $0xac] sm:$0xf] }
 0x47c   :  { %v1220_v63 = vpop.eup %1219 }
 0x47d   :  { %v739_v0 = vsel %vm331_vm1, %v1220_v63, 0.0  ;;  %v1222_v1 = vpop.eup %1221 }
 0x47e   :  { %740 = vadd.xlane.f32.xlu2 %v739_v0  ;;  %v479_v3 = vmul.f32 %v1222_v1, %v1214_v31 }
 0x484   :  { %v509_v2 = vpop.permute.xlu0 %508 }
 0x485   :  { %529 = vmatpush.msrb.mxu1 %v509_v2  ;;  %v1167_v2 = vld [vmem:[#allocation5 + $0x8c] sm:$0xf] }
 0x486   :  { %1105 = vmatmul.msk.f32.vlgmr.msrb.gmra.mxu1 %vm331_vm1, %v479_v3  ;;  %v1134_v3 = vld [vmem:[#allocation5 + $0x98] sm:$0xf0] }
 0x496   :  { %1195 = vrot.lane.b32.xlu2 %v1194_v4, %s1352_s30 }
 0x4bd   :  { %v801_v23 = vpop.permute.xlu0 %800 }
 0x4be   :  { %v822_v25 = vsel %vm276_vm0, %v1451_v59, %v801_v23 }
 0x4d9   :  { %v726_v5 = vpop.xlane.xlu2 %725 }
 0x4da   :  { %v730_v6 = vsub.f32 %v722_v49, %v726_v5  ;;  %v1137_v5 = vor.u32 %v1167_v2, %v1134_v3 }
 0x4dc   :  { %v732_v7 = vmul.f32 1.442695, %v730_v6  ;;  %v1163_v6 = vld [vmem:[#allocation5 + $0x6c] sm:$0xf] }
 0x4de   :  { %1223 = vpow2.f32 %v732_v7  ;;  %v1130_v7 = vld [vmem:[#allocation5 + $0x78] sm:$0xf0] }
 0x4e1   :  { %v609_v10 = vpop.xlane.xlu2 %608 }
 0x4e4   :  { %v1224_v8 = vpop.eup %1223 }
 0x4e5   :  { %v736_v9 = vsel %vm331_vm1, %v1224_v8, 0.0 }
 0x4e6   :  { %737 = vadd.xlane.f32.xlu1 %v736_v9  ;;  %v1133_v9 = vor.u32 %v1163_v6, %v1130_v7 }
 0x4f1   :  { %v741_v11 = vpop.xlane.xlu2 %740 }
 0x4f9   :  { %v1196_v60 = vpop.permute.xlu2 %1195 }
 0x4fa   :  { %v1197_v12 = vunpack.i.l.bf16 %v1196_v60  ;;  %v1198_v18 = vunpack.i.h.bf16 %v1196_v60 }
 0x4fc   :  { %767 = vmatpush.msra.mxu0 %v1197_v12  ;;  %v1155_v12 = vld [vmem:[#allocation5 + $0x2c] sm:$0xf] }
 0x4ff   :  { %640 = vrot.lane.b32.xlu1 %v1440_v42, %s1351_s29 }
 0x503   :  { %v531_v13 = vpop.f32.mrf.mxu1 }
 0x504   :  { %802 = vrot.lane.b32.xlu0 %v531_v13, %s1352_s30  ;;  %v1122_v13 = vld [vmem:[#allocation5 + $0x38] sm:$0xf0] }
 0x507   :  { %808 = vrot.lane.b32.xlu1 %v637_v43, %s1351_s29 }
 0x559   :  { %v738_v40 = vpop.xlane.xlu1 %737 }
 0x55a   :  { %1225 = vrcp.f32 %v738_v40  ;;  %v1125_v40 = vor.u32 %v1155_v12, %v1122_v13 }
 0x55b   :  { %1227 = vrcp.f32 %v609_v10  ;;  %v1159_v10 = vld [vmem:[#allocation5 + $0x4c] sm:$0xf] }
 0x55c   :  { %1229 = vrcp.f32 %v741_v11  ;;  %v1126_v11 = vld [vmem:[#allocation5 + $0x58] sm:$0xf0] }
 0x55d   :  { %1231 = vrcp.f32 %v1353_v35  ;;  %v1129_v60 = vor.u32 %v1159_v10, %v1126_v11 }
 0x560   :  { %v1226_v14 = vpop.eup %1225 }
 0x561   :  { %v744_v61 = vmul.f32 %v1226_v14, %v1224_v8  ;;  %v1228_v15 = vpop.eup %1227  ;;  %v1151_v14 = vld [vmem:[#allocation5 + $0xc] sm:$0xf] }
 0x562   :  { %v613_v16 = vmul.f32 %v1228_v15, %v1218_v51  ;;  %v1230_v42 = vpop.eup %1229  ;;  %v1146_v51 = vld [vmem:[#allocation5 + $0xf8] sm:$0xf0] }
 0x563   :  { %1116 = vmatmul.msk.f32.vlgmr.msra.gmra.mxu0 %vm331_vm1, %v744_v61  ;;  %v745_v19 = vmul.f32 %v1230_v42, %v1220_v63  ;;  %v1232_v59 = vpop.eup %1231  ;;  %v1149_v52 = vor.u32 %v1179_v50, %v1146_v51  ;;  %v1138_v63 = vld [vmem:[#allocation5 + $0xb8] sm:$0xf0] }
 0x564   :  { %v837_v36 = vmul.f32 128.0, %v1232_v59  ;;  %vm841_vm4 = vweird.f32 %v1232_v59  ;;  %v1141_v0 = vor.u32 %v1171_v58, %v1138_v63  ;;  %v1118_v61 = vld [vmem:[#allocation5 + $0x18] sm:$0xf0] }
 0x565   :  { %916 = vmatpush.bf16.msrb.mxu2 %v1149_v52 }
 0x566   :  { %v838_v37 = vsub.f32 1.0, %v837_v36 }
 0x568   :  { %v839_v38 = vmul.f32 %v1232_v59, %v838_v37 }
 0x569   :  { %917 = vmatpush.bf16.msrb.mxu2 %v1145_v55 }
 0x56a   :  { %v840_v39 = vadd.f32 %v1232_v59, %v839_v38  ;;  %v95_v38 = vld [vmem:[#allocation7 + $0x1] ss:$0 sm:$0xff] }
 0x56d   :  { %918 = vmatpush.bf16.msrb.mxu2 %v1141_v0 }
 0x571   :  { %v641_v17 = vpop.permute.xlu1 %640  ;;  %919 = vmatpush.bf16.msrb.mxu2 %v1137_v5 }
 0x572   :  { %661 = vmatpush.msra.mxu1 %v641_v17 }
 0x573   :  { %1111 = vmatmul.msk.f32.vlgmr.msra.gmra.mxu1 %vm331_vm1, %v613_v16  ;;  %v1121_v16 = vor.u32 %v1151_v14, %v1118_v61 }
 0x574   :  { %793 = vmatpush.msrb.mxu1 %v1198_v18 }
 0x575   :  { %920 = vmatpush.bf16.msrb.mxu2 %v1133_v9 }
 0x576   :  { %v803_v29 = vpop.permute.xlu0 %802 }
 0x577   :  { %v823_v31 = vsel %vm276_vm0, %v1453_v62, %v803_v29 }
 0x579   :  { %v809_v24 = vpop.permute.xlu1 %808  ;;  %921 = vmatpush.bf16.msrb.mxu2 %v1129_v60 }
 0x57a   :  { %v825_v26 = vsel %vm824_vm2, %v822_v25, %v809_v24 }
 0x57b   :  { %1117 = vmatmul.msk.f32.vlgmr.msrb.gmra.mxu1 %vm331_vm1, %v745_v19 }
 0x57d   :  { %922 = vmatpush.bf16.msrb.mxu2 %v1125_v40 }
 0x581   :  { %923 = vmatpush.bf16.msrb.mxu2 %v1121_v16 }
 0x5e0   :  { %v769_v20 = vpop.f32.mrf.mxu0 }
 0x5e1   :  { %816 = vrot.lane.b32.xlu2 %v769_v20, %s1350_s2 }
 0x5f0   :  { %v663_v21 = vpop.f32.mrf.mxu1 }
 0x5f1   :  { %810 = vrot.lane.b32.xlu0 %v663_v21, %s1351_s29 }
 0x5f8   :  { %v795_v22 = vpop.f32.mrf.mxu1 }
 0x5f9   :  { %818 = vrot.lane.b32.xlu1 %v795_v22, %s1350_s2 }
 0x63b   :  { %v817_v27 = vpop.permute.xlu2 %816 }
 0x63c   :  { %v828_v28 = vsel %vm827_vm3, %v825_v26, %v817_v27 }
 0x63d   :  { %v830_v56 = vadd.f32 %v828_v28, %v1387_v47  ;;  %v1512_v47 = vsel %vm841_vm4, %v1232_v59, %v840_v39 }
 0x63f   :  { %832 = vadd.xlane.f32.xlu0 %v830_v56 }
 0x663   :  { %v811_v30 = vpop.permute.xlu0 %810 }
 0x664   :  { %v826_v32 = vsel %vm824_vm2, %v823_v31, %v811_v30  ;;  %v1527_v31 = vld [vmem:[#allocation7 + $0x9] ss:$0 sm:$0xff] }
 0x66b   :  { %v819_v57 = vpop.permute.xlu1 %818 }
 0x66c   :  { %v829_v33 = vsel %vm827_vm3, %v826_v32, %v819_v57 }
 0x66d   :  { %v831_v34 = vadd.f32 %v829_v33, %v1389_v48 }
 0x66f   :  { %834 = vadd.xlane.f32.xlu2 %v831_v34 }
 0x6b2   :  { %v833_v41 = vpop.xlane.xlu0 %832 }
 0x6b3   :  { %v843_v43 = vmul.f32 %v1512_v47, %v833_v41 }
 0x6b5   :  { %v1515_v62 = vsub.f32 %v830_v56, %v843_v43 }
 0x6b7   :  { %v847_v44 = vmul.f32 %v1515_v62, %v1515_v62 }
 0x6b9   :  { %849 = vadd.xlane.f32.xlu1 %v847_v44 }
 0x6e2   :  { %v835_v48 = vpop.xlane.xlu2 %834 }
 0x6e3   :  { %v844_v45 = vmul.f32 %v1512_v47, %v835_v48 }
 0x6e5   :  { %v1520_v46 = vsub.f32 %v831_v34, %v844_v45  ;;  %v97_v34 = vld [vmem:[#allocation7 + $0x11] ss:$0 sm:$0xff] }
 0x6e7   :  { %v848_v49 = vmul.f32 %v1520_v46, %v1520_v46 }
 0x6e9   :  { %851 = vadd.xlane.f32.xlu0 %v848_v49 }
 0x72c   :  { %v850_v1 = vpop.xlane.xlu1 %849 }
 0x72d   :  { %v853_v4 = vmul.f32 %v850_v1, %v1512_v47 }
 0x72f   :  { %v855_v8 = vadd.f32 1e-05, %v853_v4 }
 0x731   :  { %1233 = vrsqrt.f32 %v855_v8  ;;  %vm863_vm6 = vweird.f32 %v855_v8 }
 0x737   :  { %v1234_v15 = vpop.eup %1233 }
 0x738   :  { %v858_v17 = vmul.f32 %v1234_v15, %v855_v8  ;;  %vm864_vm5 = vweird.f32 %v1234_v15 }
 0x739   :  { %vm865_vm7 = vmor %vm863_vm6, %vm864_vm5 }
 0x73a   :  { %v859_v18 = vmul.f32 %v1234_v15, %v858_v17 }
 0x73c   :  { %v860_v21 = vmul.f32 0.5, %v859_v18 }
 0x73e   :  { %v861_v22 = vsub.f32 1.5, %v860_v21 }
 0x740   :  { %v862_v24 = vmul.f32 %v1234_v15, %v861_v22 }
 0x742   :  { %v866_v27 = vsel %vm865_vm7, %v1234_v15, %v862_v24 }
 0x743   :  { %v877_v29 = vmul.f32 %v866_v27, %v1515_v62 }
 0x745   :  { %v879_v33 = vmul.f32 %v877_v29, %v1527_v31 }
 0x747   :  { %v881_v59 = vadd.f32 %v879_v33, %v97_v34 }
 0x75c   :  { %v852_v42 = vpop.xlane.xlu0 %851 }
 0x75d   :  { %v854_v19 = vmul.f32 %v852_v42, %v1512_v47 }
 0x75f   :  { %v856_v20 = vadd.f32 1e-05, %v854_v19 }
 0x761   :  { %1235 = vrsqrt.f32 %v856_v20  ;;  %vm873_vm9 = vweird.f32 %v856_v20 }
 0x767   :  { %v1236_v23 = vpop.eup %1235 }
 0x768   :  { %v868_v25 = vmul.f32 %v1236_v23, %v856_v20  ;;  %vm874_vm8 = vweird.f32 %v1236_v23 }
 0x769   :  { %vm875_vm10 = vmor %vm873_vm9, %vm874_vm8 }
 0x76a   :  { %v869_v26 = vmul.f32 %v1236_v23, %v868_v25 }
 0x76c   :  { %v870_v28 = vmul.f32 0.5, %v869_v26 }
 0x76e   :  { %v871_v56 = vsub.f32 1.5, %v870_v28 }
 0x770   :  { %v872_v30 = vmul.f32 %v1236_v23, %v871_v56 }
 0x772   :  { %v876_v32 = vsel %vm875_vm10, %v1236_v23, %v872_v30 }
 0x773   :  { %v878_v57 = vmul.f32 %v876_v32, %v1520_v46 }
 0x775   :  { %v880_v35 = vmul.f32 %v878_v57, %v1527_v31 }
 0x777   :  { %v882_v36 = vadd.f32 %v880_v35, %v97_v34 }
 0x779   :  { %v883_v37 = vpack.c.bf16 %v882_v36, %v881_v59 }
 0x77b   :  { %924 = vmatmul.bf16.vlgmr.msrb.gmra.mxu2 %v883_v37 }
 0x7fe   :  { %v925_v39 = vpop.f32.mrf.mxu2 }
 0x7ff   :  { %v926_v41 = vadd.f32 %v925_v39, %v95_v38 }
 0x801   :  { %v930_v43 = vadd.f32 %v926_v41, %v881_v59 }
 0x803   :  { %932 = vadd.xlane.f32.xlu2 %v930_v43 }
 0x806   :  { %v927_v62 = vpop.f32.mrf.mxu2 }
 0x807   :  { %v928_v44 = vadd.f32 %v927_v62, %v95_v38 }
 0x809   :  { %v931_v48 = vadd.f32 %v928_v44, %v882_v36 }
 0x80b   :  { %934 = vadd.xlane.f32.xlu1 %v931_v48 }
 0x876   :  { %v933_v45 = vpop.xlane.xlu2 %932 }
 0x877   :  { %v936_v46 = vmul.f32 %v933_v45, %v1512_v47 }
 0x879   :  { %v938_v49 = vsub.f32 %v930_v43, %v936_v46 }
 0x87b   :  { %v940_v50 = vmul.f32 %v938_v49, %v938_v49 }
 0x87d   :  { %942 = vadd.xlane.f32.xlu0 %v940_v50 }
 0x87e   :  { %v935_v51 = vpop.xlane.xlu1 %934 }
 0x87f   :  { %v937_v52 = vmul.f32 %v935_v51, %v1512_v47 }
 0x881   :  { %v939_v53 = vsub.f32 %v931_v48, %v937_v52 }
 0x883   :  { %v941_v54 = vmul.f32 %v939_v53, %v939_v53 }
 0x885   :  { %944 = vadd.xlane.f32.xlu2 %v941_v54 }
 0x8f0   :  { %v943_v55 = vpop.xlane.xlu0 %942 }
 0x8f1   :  { %v946_v58 = vmul.f32 %v943_v55, %v1512_v47 }
 0x8f3   :  { %v948_v63 = vadd.f32 1e-05, %v946_v58 }
 0x8f5   :  { %1237 = vrsqrt.f32 %v948_v63  ;;  %vm956_vm12 = vweird.f32 %v948_v63 }
 0x8f8   :  { %v945_v0 = vpop.xlane.xlu2 %944 }
 0x8f9   :  { %v947_v1 = vmul.f32 %v945_v0, %v1512_v47 }
 0x8fb   :  { %v1238_v2 = vpop.eup %1237  ;;  %v949_v3 = vadd.f32 1e-05, %v947_v1 }
 0x8fc   :  { %v951_v4 = vmul.f32 %v1238_v2, %v948_v63  ;;  %vm957_vm11 = vweird.f32 %v1238_v2 }
 0x8fd   :  { %1239 = vrsqrt.f32 %v949_v3  ;;  %vm958_vm13 = vmor %vm956_vm12, %vm957_vm11  ;;  %vm966_vm15 = vweird.f32 %v949_v3 }
 0x8fe   :  { %v952_v5 = vmul.f32 %v1238_v2, %v951_v4 }
 0x900   :  { %v953_v6 = vmul.f32 0.5, %v952_v5 }
 0x902   :  { %v954_v7 = vsub.f32 1.5, %v953_v6 }
 0x903   :  { %v1240_v8 = vpop.eup %1239 }
 0x904   :  { %v955_v9 = vmul.f32 %v1238_v2, %v954_v7  ;;  %v961_v10 = vmul.f32 %v1240_v8, %v949_v3  ;;  %vm967_vm14 = vweird.f32 %v1240_v8 }
 0x905   :  { %vm968_vm0 = vmor %vm966_vm15, %vm967_vm14 }
 0x906   :  { %v959_v11 = vsel %vm958_vm13, %v1238_v2, %v955_v9  ;;  %v962_v60 = vmul.f32 %v1240_v8, %v961_v10 }
 0x907   :  { %v970_v12 = vmul.f32 %v959_v11, %v938_v49 }
 0x908   :  { %v963_v13 = vmul.f32 0.5, %v962_v60 }
 0x909   :  { %v972_v40 = vmul.f32 %v970_v12, %v1527_v31 }
 0x90a   :  { %v964_v47 = vsub.f32 1.5, %v963_v13 }
 0x90b   :  { %v974_v14 = vadd.f32 %v972_v40, %v97_v34 }
 0x90c   :  { %v965_v61 = vmul.f32 %v1240_v8, %v964_v47 }
 0x90d   :  { %976 = vst [vmem:[#allocation8] sm:$0xff] %v974_v14 }
 0x90e   :  { %v969_v15 = vsel %vm968_vm0, %v1240_v8, %v965_v61 }
 0x90f   :  { %v971_v16 = vmul.f32 %v969_v15, %v939_v53 }
 0x911   :  { %v973_v17 = vmul.f32 %v971_v16, %v1527_v31 }
 0x913   :  { %v975_v18 = vadd.f32 %v973_v17, %v97_v34 }
 0x915   :  { %977 = vst [vmem:[#allocation8 + $0x8] sm:$0xff] %v975_v18 }
 0x916   :  { %990 = dma.vmem_to_hbm [thread:$0]  %s983_s5, 256, %s985_s8, [#allocation4], %s1347_s24, %s1347_s24, %s1348_s25  }
 0x917   :  { %1341 = dma.done.wait [#allocation4], 256  }
 0x918   :  { %1342 = vsyncadd [#allocation4], 4294967040 }
 0x919   :  { %995 = vsyncpa [#allocation3], 1 }
 0x91a   :  { %996 = vsyncpa [#allocation6], 1 }
 0x91b   :  { %997 = vsyncpa [#allocation4], 1 }

</bundles_post_ra>
